<compile_context>
chip_gen: v7x
topology: tpu7x:2x2x1
jax: 0.10.0
libtpu: 0.0.40
codegen_flags: <defaults>
</compile_context>

<pallas_src>
import functools

import jax
import jax.numpy as jnp
from jax.experimental import pallas as pl
from jax.experimental.pallas import tpu as pltpu


# ----------------------------------------------------------------------------
# helpers
# ----------------------------------------------------------------------------
def _round_up(x, m):
    return ((x + m - 1) // m) * m


# ----------------------------------------------------------------------------
# Pallas kernel 1: single-pass matmul with fused bias + ReLU (conv hot path)
#   - bf16 A/B operands feed the MXU natively (v5e/v6e/v7x), f32 accumulation
#   - full-K reduction in one MXU pass: no k grid axis, no acc scratch,
#     no init/finalize pl.when, relu(dot+bias) written straight to o_ref
#   - tiles chosen to exactly cover M/N (no padding copies, no output slicing)
# ----------------------------------------------------------------------------
def _mm_bias_relu_kernel(a_ref, b_ref, bias_ref, o_ref):
    acc = jnp.dot(a_ref[...], b_ref[...], preferred_element_type=jnp.float32)
    o_ref[...] = jnp.maximum(acc + bias_ref[...], 0.0).astype(o_ref.dtype)


def matmul_bias_relu(A, B, bias, *, tm_max=512, tn_max=256):
    """relu(A @ B + bias);  A:(M,K), B:(K,N), bias:(N,) -> (M,N) f32."""
    M, K = A.shape
    K2, N = B.shape
    assert K == K2
    A = A.astype(jnp.bfloat16)
    B = B.astype(jnp.bfloat16)
    bias2d = bias.astype(jnp.float32).reshape(1, N)

    # Block shapes: either the full dim (always legal) or an 8/128-aligned tile.
    tm = M if M <= tm_max else tm_max          # 512 is 8-aligned
    tn = N if N <= tn_max else tn_max          # 256 is 128-aligned
    grid = (pl.cdiv(M, tm), pl.cdiv(N, tn))

    # double-buffered VMEM footprint for this tiling (bf16 A/B, f32 bias/out)
    tile_bytes = 2 * (tm * K * 2 + K * tn * 2 + tm * tn * 4 + tn * 4)
    vmem_limit = int(min(max(tile_bytes + (4 << 20), 32 << 20), 56 << 20))

    return pl.pallas_call(
        _mm_bias_relu_kernel,
        out_shape=jax.ShapeDtypeStruct((M, N), jnp.float32),
        grid=grid,
        in_specs=[
            pl.BlockSpec((tm, K), lambda i, j: (i, 0)),
            pl.BlockSpec((K, tn), lambda i, j: (0, j)),
            pl.BlockSpec((1, tn), lambda i, j: (0, j)),
        ],
        out_specs=pl.BlockSpec((tm, tn), lambda i, j: (i, j)),
        compiler_params=pltpu.CompilerParams(
            dimension_semantics=("parallel", "parallel"),
            vmem_limit_bytes=vmem_limit),
    )(A, B, bias2d)


# ----------------------------------------------------------------------------
# Pallas kernel 2: grid-tiled L1 (mean absolute error) reduction
#   - streams (block_rows, 128) tiles through VMEM (pipelined DMA)
#   - accumulates into a resident SMEM scalar; divides by true count at the end
#   - partial last block is masked in-kernel (no pad pass over the tensors)
# ----------------------------------------------------------------------------
def _l1_mean_kernel(a_ref, b_ref, o_ref, *, rows, block_rows, count, mask_rows):
    i = pl.program_id(0)

    @pl.when(i == 0)
    def _():
        o_ref[0, 0] = 0.0

    diff = jnp.abs(a_ref[...].astype(jnp.float32) - b_ref[...].astype(jnp.float32))
    if mask_rows:
        ridx = i * block_rows + jax.lax.broadcasted_iota(jnp.int32, diff.shape, 0)
        diff = jnp.where(ridx < rows, diff, 0.0)
    o_ref[0, 0] += jnp.sum(diff)

    @pl.when(i == pl.num_programs(0) - 1)
    def _():
        o_ref[0, 0] = o_ref[0, 0] / count


def l1_mean(a, b, *, block_rows_max=512):
    """mean(|a - b|) over all elements (same semantics as nn.L1Loss())."""
    assert a.shape == b.shape
    count = int(a.size)
    lane = 128
    af = a.reshape(-1).astype(jnp.float32)
    bf = b.reshape(-1).astype(jnp.float32)
    if count % lane != 0:  # rare fallback; |0-0| = 0, divide by true count
        pad = _round_up(count, lane) - count
        af = jnp.pad(af, (0, pad))
        bf = jnp.pad(bf, (0, pad))
    rows = af.size // lane
    af = af.reshape(rows, lane)
    bf = bf.reshape(rows, lane)

    block_rows = rows if rows <= block_rows_max else block_rows_max
    nblk = pl.cdiv(rows, block_rows)
    mask_rows = (rows % block_rows) != 0

    out = pl.pallas_call(
        functools.partial(_l1_mean_kernel, rows=rows, block_rows=block_rows,
                          count=float(count), mask_rows=mask_rows),
        out_shape=jax.ShapeDtypeStruct((1, 1), jnp.float32),
        grid=(nblk,),
        in_specs=[
            pl.BlockSpec((block_rows, lane), lambda i: (i, 0)),
            pl.BlockSpec((block_rows, lane), lambda i: (i, 0)),
        ],
        out_specs=pl.BlockSpec(memory_space=pltpu.MemorySpace.SMEM),
        compiler_params=pltpu.CompilerParams(
            dimension_semantics=("arbitrary",)),
    )(af, bf)
    return out[0, 0]


# ----------------------------------------------------------------------------
# VGG19 feature extractor (conv = bf16 im2col + Pallas matmul; pool/pad = glue)
# ----------------------------------------------------------------------------
# (starts_with_maxpool, [(cin, cout), ...]) per block; features taken after
# the last ReLU of each block (torchvision vgg19.features indices 3,8,17,26,35)
VGG_CFG = [
    (False, [(3, 64), (64, 64)]),
    (True,  [(64, 128), (128, 128)]),
    (True,  [(128, 256), (256, 256), (256, 256), (256, 256)]),
    (True,  [(256, 512), (512, 512), (512, 512), (512, 512)]),
    (True,  [(512, 512), (512, 512), (512, 512), (512, 512)]),
]
VGG_FEATURE_WEIGHTS = [0.1, 0.1, 1.0, 1.0, 1.0]


def init_vgg_params(key):
    """He-init VGG19 conv weights, pre-reshaped to (9*Cin, Cout) bf16 matrices."""
    params = []
    idx = 0
    for pool, convs in VGG_CFG:
        block = []
        for cin, cout in convs:
            wkey = jax.random.fold_in(key, idx)
            idx += 1
            w = jax.random.normal(wkey, (3, 3, cin, cout), jnp.float32) * jnp.sqrt(2.0 / (9 * cin))
            w_mat = w.reshape(9 * cin, cout).astype(jnp.bfloat16)  # (kh,kw,cin) order
            b = jnp.zeros((cout,), jnp.float32)
            block.append((w_mat, b))
        params.append((pool, block))
    return params


def conv3x3_relu(x, w_mat, b):
    """x: (N,H,W,Cin) f32, w_mat: (9*Cin,Cout) bf16, b: (Cout,) -> (N,H,W,Cout) f32."""
    N, H, W, Cin = x.shape
    Cout = w_mat.shape[-1]
    xb = x.astype(jnp.bfloat16)                 # emit im2col in bf16: halves HBM traffic
    xp = jnp.pad(xb, ((0, 0), (1, 1), (1, 1), (0, 0)))
    # TODO(synk): im2col still materializes a 9*Cin-wide bf16 matrix in HBM; a fully
    # fused 9-tap direct-conv Pallas kernel would remove this redundant traffic.
    patches = [xp[:, kh:kh + H, kw:kw + W, :] for kh in range(3) for kw in range(3)]
    A = jnp.concatenate(patches, axis=-1).reshape(N * H * W, 9 * Cin)
    out = matmul_bias_relu(A, w_mat, b)         # Pallas MXU matmul + bias + ReLU
    return out.reshape(N, H, W, Cout)


def maxpool2x2(x):
    N, H, W, C = x.shape
    x = x[:, :2 * (H // 2), :2 * (W // 2), :]   # floor odd dims like nn.MaxPool2d
    return x.reshape(N, H // 2, 2, W // 2, 2, C).max(axis=(2, 4))


def vgg19_features(x_nhwc, params):
    x = (x_nhwc - 0.45) / 0.225                 # matches VGG19FeatureExtractor.forward
    feats = []
    for pool, block in params:
        if pool:
            x = maxpool2x2(x)
        for w_mat, b in block:
            x = conv3x3_relu(x, w_mat, b)
        feats.append(x)
    return feats


# ----------------------------------------------------------------------------
# LPSRGANLoss forward
# ----------------------------------------------------------------------------
def lpsrgan_loss(img1_nchw, img2_nchw, lp_gt, loss_adv, vgg_params):
    """Mirrors LPSRGANLoss.forward(img1, img2, lp_gt, loss_adv)."""
    del loss_adv  # unused in the reference forward as well
    # layout: inputs NCHW (PyTorch); kernels operate on NHWC
    x1 = jnp.transpose(img1_nchw, (0, 2, 3, 1)).astype(jnp.float32)
    x2 = jnp.transpose(img2_nchw, (0, 2, 3, 1)).astype(jnp.float32)
    n = x1.shape[0]

    # loss_mae = nn.L1Loss()(img1, img2)
    loss_mae = l1_mean(x1, x2)

    # vgg_loss = sum_i w_i * L1(feat_i(img1), feat_i(img2))
    # single batched VGG pass over [img1; img2] -> half the launches / weight DMAs
    feats = vgg19_features(jnp.concatenate([x1, x2], axis=0), vgg_params)
    vgg_loss = jnp.float32(0.0)
    for w, f in zip(VGG_FEATURE_WEIGHTS, feats):
        vgg_loss = vgg_loss + w * l1_mean(f[:n], f[n:])

    # TODO(synk): OCRLoss needs an external TF OCR model + cv2 preprocessing and
    # string comparison; no Pallas equivalent. With load=None (as constructed
    # here) the reference OCR is unavailable, so ocr_loss contributes 0.
    ocr_loss = jnp.float32(0.0)
    preds = list(lp_gt)  # placeholder predicted_text

    total = loss_mae + vgg_loss + ocr_loss
    return total, preds


# ----------------------------------------------------------------------------
# main
# ----------------------------------------------------------------------------
if __name__ == "__main__":
    key = jax.random.PRNGKey(0)
    k1, k2, kp = jax.random.split(key, 3)

    # small shapes consistent with the module: RGB images, batch=2, 16x16
    img1 = jax.random.uniform(k1, (2, 3, 16, 16), jnp.float32)
    img2 = jax.random.uniform(k2, (2, 3, 16, 16), jnp.float32)
    lp_gt = ["ABC1234", "XYZ5678"]
    loss_adv = jnp.float32(0.0)

    vgg_params = init_vgg_params(kp)

    total_loss, preds = lpsrgan_loss(img1, img2, lp_gt, loss_adv, vgg_params)
    total_loss = jax.block_until_ready(total_loss)
    assert bool(jnp.isfinite(total_loss))
    print("KERNEL_OK")
</pallas_src>

<mosaic_0001>
module attributes {stable_mosaic.version = 11 : i64} {
  func.func @_l1_mean_kernel(%arg0: i32, %arg1: memref<12x128xf32, #tpu.memory_space<vmem>>, %arg2: memref<12x128xf32, #tpu.memory_space<vmem>>, %arg3: memref<1x1xf32, #tpu.memory_space<smem>>) attributes {dimension_semantics = [#tpu.dimension_semantics<arbitrary>], iteration_bounds = array<i64: 1>, scalar_prefetch = 0 : i64, scratch_operands = 0 : i64, tpu.core_type = #tpu.core_type<tc>, window_params = [{transform_indices = @transform_0, window_bounds = array<i64: 12, 128>}, {transform_indices = @transform_1, window_bounds = array<i64: 12, 128>}, {transform_indices = @transform_2, window_bounds = array<i64: 1, 1>}]} {
    %c0_i32 = arith.constant 0 : i32
    %0 = arith.cmpi eq, %arg0, %c0_i32 : i32
    %1 = arith.extui %0 : i1 to i32
    %c0_i32_0 = arith.constant 0 : i32
    %2 = arith.cmpi ne, %1, %c0_i32_0 : i32
    scf.if %2 {
      %cst_10 = arith.constant 0.000000e+00 : f32
      %c0_11 = arith.constant 0 : index
      %c0_12 = arith.constant 0 : index
      %17 = memref.load %arg3[%c0_11, %c0_12] : memref<1x1xf32, #tpu.memory_space<smem>>
      memref.store %cst_10, %arg3[%c0_11, %c0_12] : memref<1x1xf32, #tpu.memory_space<smem>>
    } else {
    }
    %c0 = arith.constant 0 : index
    %c0_1 = arith.constant 0 : index
    %3 = vector.load %arg1[%c0, %c0_1] : memref<12x128xf32, #tpu.memory_space<vmem>>, vector<12x128xf32>
    %c0_2 = arith.constant 0 : index
    %c0_3 = arith.constant 0 : index
    %4 = vector.load %arg2[%c0_2, %c0_3] : memref<12x128xf32, #tpu.memory_space<vmem>>, vector<12x128xf32>
    %5 = arith.subf %3, %4 : vector<12x128xf32>
    %6 = math.absf %5 : vector<12x128xf32>
    %c0_4 = arith.constant 0 : index
    %c0_5 = arith.constant 0 : index
    %7 = memref.load %arg3[%c0_4, %c0_5] : memref<1x1xf32, #tpu.memory_space<smem>>
    %8 = vector.shape_cast %6 : vector<12x128xf32> to vector<1x12x128xf32>
    %cst = arith.constant dense<0.000000e+00> : vector<1xf32>
    %9 = vector.multi_reduction <add>, %8, %cst [1, 2] : vector<1x12x128xf32> to vector<1xf32>
    %10 = vector.shape_cast %9 : vector<1xf32> to vector<1x1x1xf32>
    %11 = vector.extract %10[0, 0, 0] : f32 from vector<1x1x1xf32>
    %12 = arith.addf %7, %11 : f32
    %c0_6 = arith.constant 0 : index
    %c0_7 = arith.constant 0 : index
    %13 = memref.load %arg3[%c0_6, %c0_7] : memref<1x1xf32, #tpu.memory_space<smem>>
    memref.store %12, %arg3[%c0_6, %c0_7] : memref<1x1xf32, #tpu.memory_space<smem>>
    %c0_i32_8 = arith.constant 0 : i32
    %14 = arith.cmpi eq, %arg0, %c0_i32_8 : i32
    %15 = arith.extui %14 : i1 to i32
    %c0_i32_9 = arith.constant 0 : i32
    %16 = arith.cmpi ne, %15, %c0_i32_9 : i32
    scf.if %16 {
      %c0_10 = arith.constant 0 : index
      %c0_11 = arith.constant 0 : index
      %17 = memref.load %arg3[%c0_10, %c0_11] : memref<1x1xf32, #tpu.memory_space<smem>>
      %cst_12 = arith.constant 1.536000e+03 : f32
      %18 = arith.divf %17, %cst_12 : f32
      %c0_13 = arith.constant 0 : index
      %c0_14 = arith.constant 0 : index
      %19 = memref.load %arg3[%c0_13, %c0_14] : memref<1x1xf32, #tpu.memory_space<smem>>
      memref.store %18, %arg3[%c0_13, %c0_14] : memref<1x1xf32, #tpu.memory_space<smem>>
    } else {
    }
    return
  }
  func.func @transform_0(%arg0: i32) -> (i32, i32) {
    %c0_i32 = arith.constant 0 : i32
    %c0_i32_0 = arith.constant 0 : i32
    return %arg0, %c0_i32 : i32, i32
  }
  func.func @transform_1(%arg0: i32) -> (i32, i32) {
    %c0_i32 = arith.constant 0 : i32
    %c0_i32_0 = arith.constant 0 : i32
    return %arg0, %c0_i32 : i32, i32
  }
  func.func @transform_2(%arg0: i32) -> (i32, i32) {
    %c0_i32 = arith.constant 0 : i32
    %c0_i32_0 = arith.constant 0 : i32
    %c0_i32_1 = arith.constant 0 : i32
    return %c0_i32, %c0_i32_0 : i32, i32
  }
}

</mosaic_0001>

<bundles_post_ra>
// kernel: tpu_custom_call.1
= control target key start
LH: loop header
LB: loop body
LE: loop exit
PB: predicated region body
PF: predicated region fallthrough
CT: control target
= control target key end

     0   :  { %7 = vsyncpa [#allocation3], 0  ;;  %s217_s0 = inlined_call_operand.hbm [shape: f32[12,128], index: 0, kind: input, shape index: {}]   ;;  %s218_s1 = inlined_call_operand.hbm [shape: f32[12,128], index: 1, kind: input, shape index: {}]   ;;  %s219_s2 = inlined_call_operand.hbm [shape: f32[1,1], index: 2, kind: output, shape index: {}]  }
   0x1   :  { %8 = vsyncpa [#allocation6], 0 }
   0x2   :  { %9 = vsyncpa [#allocation4], 0  ;;  %s161_s9 = smov [#allocation2]   ;;  %s101_s13 = scalar_lea.hbm %s217_s0, 256 }
   0x3   :  { %s15_s10 = sshll.u32 %s161_s9, 4  ;;  %p102_p0 = scmp.ne.s32.totalorder %s217_s0, %s101_s13  ;;  %s16_s10 = int_to_ptr.vmem [resolvable:$true] %s15_s10 }
   0x4   :  { %p105_p1 = scmp.lt.u32.totalorder %s101_s13, %s217_s0 }
   0x6   :  { %p107_p2 = pnand %p105_p1, %p102_p0 }
   0x8   :  { %110 = shalt.err (!%p107_p2)
}
   0x9   :  { %s111_s18 = scalar_lea.vmem %s16_s10, 256  ;;  %p116_p4 = scmp.lt.s32.totalorder %s16_s10, %s16_s10 }
   0xa   :  { %p112_p3 = scmp.ne.s32.totalorder %s16_s10, %s111_s18  ;;  %p117_p5 = scmp.lt.s32.totalorder %s111_s18, %s111_s18 }
   0xc   :  { %p118_p6 = por %p117_p5, %p116_p4 }
   0xe   :  { %p119_p7 = pnand %p118_p6, %p112_p3 }
  0x10   :  { %122 = shalt.err (!%p119_p7)
}
  0x11   :  { %s162_s19 = smov 128   ;;  %s163_s20 = smov 8  }
  0x12   :  { %21 = dma.hbm_to_vmem [thread:$0]  %s217_s0, 256, %s16_s10, [#allocation3], %s162_s19, %s162_s19, %s163_s20  }
  0x13   :  { %s164_s23 = smov [#allocation5]   ;;  %s123_s27 = scalar_lea.hbm %s218_s1, 256 }
  0x14   :  { %s27_s24 = sshll.u32 %s164_s23, 4  ;;  %p124_p8 = scmp.ne.s32.totalorder %s218_s1, %s123_s27  ;;  %s28_s24 = int_to_ptr.vmem [resolvable:$true] %s27_s24 }
  0x15   :  { %p127_p9 = scmp.lt.u32.totalorder %s123_s27, %s218_s1 }
  0x17   :  { %p129_p10 = pnand %p127_p9, %p124_p8 }
  0x19   :  { %132 = shalt.err (!%p129_p10)
}
  0x1a   :  { %s133_s4 = scalar_lea.vmem %s28_s24, 256  ;;  %p138_p12 = scmp.lt.s32.totalorder %s28_s24, %s28_s24 }
  0x1b   :  { %p134_p11 = scmp.ne.s32.totalorder %s28_s24, %s133_s4  ;;  %p139_p13 = scmp.lt.s32.totalorder %s133_s4, %s133_s4 }
  0x1d   :  { %p140_p0 = por %p139_p13, %p138_p12 }
  0x1f   :  { %p141_p1 = pnand %p140_p0, %p134_p11 }
  0x21   :  { %144 = shalt.err (!%p141_p1)
}
  0x22   :  { %33 = dma.hbm_to_vmem [thread:$0]  %s218_s1, 256, %s28_s24, [#allocation6], %s162_s19, %s162_s19, %s163_s20  }
  0x23   :  { %155 = dma.done.wait [#allocation3], 256  }
  0x24   :  { %156 = vsyncadd [#allocation3], 4294967040 }
  0x25   :  { %157 = dma.done.wait [#allocation6], 256  }
  0x26   :  { %158 = vsyncadd [#allocation6], 4294967040  ;;  %v46_v0 = vld [vmem:[#allocation2] sm:$0xff]  ;;  %v47_v1 = vld [vmem:[#allocation2 + $0x8] sm:$0xf]  ;;  %vm55_vm0 = vcmask 1043456  }
  0x27   :  { %v48_v2 = vld [vmem:[#allocation5] sm:$0xff]  ;;  %v49_v3 = vld [vmem:[#allocation5 + $0x8] sm:$0xf]  ;;  %s145_s9 = scalar_lea.hbm %s219_s2, 16 }
  0x28   :  { %v50_v4 = vsub.f32 %v46_v0, %v48_v2  ;;  %v51_v5 = vsub.f32 %v47_v1, %v49_v3  ;;  %p146_p2 = scmp.ne.s32.totalorder %s219_s2, %s145_s9  ;;  %p149_p3 = scmp.lt.u32.totalorder %s145_s9, %s219_s2 }
  0x2a   :  { %v52_v6 = vand.u32 2147483647, %v50_v4  ;;  %v53_v7 = vand.u32 2147483647, %v51_v5  ;;  %p151_p4 = pnand %p149_p3, %p146_p2 }
  0x2c   :  { %v56_v8 = vsel %vm55_vm0, %v53_v7, 0.0 }
  0x2d   :  { %v57_v9 = vadd.f32 %v56_v8, %v52_v6 }
  0x2f   :  { %58 = vadd.xlane.f32.xlu0 %v57_v9 }
  0xbc   :  { %v59_v10 = vpop.xlane.xlu0 %58 }
  0xbd   :  { %v60_v11 = vrot.slane %v59_v10, 4 }
  0xbf   :  { %v61_v12 = vadd.f32 %v60_v11, %v59_v10 }
  0xc1   :  { %v62_v13 = vrot.slane %v61_v12, 2 }
  0xc3   :  { %v63_v14 = vadd.f32 %v62_v13, %v61_v12 }
  0xc5   :  { %v64_v15 = vrot.slane %v63_v14, 1 }
  0xc7   :  { %v65_v16 = vadd.f32 %v64_v15, %v63_v14 }
  0xc9   :  { %93 = vpush %v65_v16 }
  0xfa   :  { %s94_s1 = spop %93 }
  0xfb   :  { %s76_s6 = smul.f32 0.0006510417, %s94_s1 }
  0xfd   :  { %77 = sst [smem:[#allocation7]] %s76_s6 }
  0xfe   :  { %154 = shalt.err (!%p151_p4)
}
  0xff   :  { %s165_s14 = smov [#allocation7]  }
 0x100   :  { %85 = dma.smem_to_hbm %s165_s14, 16, %s219_s2, [#allocation4]  }
 0x101   :  { %159 = dma.done.wait [#allocation4], 16  }
 0x102   :  { %160 = vsyncadd [#allocation4], 4294967280 }
 0x103   :  { %89 = sfence }
 0x104   :  { %90 = vsyncpa [#allocation3], 1 }
 0x105   :  { %91 = vsyncpa [#allocation6], 1 }
 0x106   :  { %92 = vsyncpa [#allocation4], 1 }

</bundles_post_ra>
